<compile_context>
chip_gen: v7x
topology: tpu7x:2x2x1
jax: 0.10.0
libtpu: 0.0.40
codegen_flags: <defaults>
</compile_context>

<pallas_src>
import functools

import jax
import jax.numpy as jnp
from jax import lax
from jax.experimental import pallas as pl
from jax.experimental.pallas import tpu as pltpu

_LANE = 128  # TPU lane width


def _round_up(x, m):
    return ((x + m - 1) // m) * m


def _pick_tiling(n, tm_hint):
    """Row-tile size / tile count / padded row count for N = B*T rows."""
    tm = max(8, min(_round_up(tm_hint, 8), _round_up(n, 8)))
    n_tiles = -(-n // tm)
    if n_tiles > 1 and n_tiles % 2:
        # Nudge to an even tile count so the "parallel" axis splits evenly
        # across v7x's 2 TensorCores (no-op on single-TC v5e/v6e).
        n_tiles += 1
        tm = max(8, _round_up(-(-n // n_tiles), 8))
        n_tiles = -(-n // tm)
    return tm, n_tiles, tm * n_tiles


def _logsumexp_rows(t):
    m = jnp.max(t, axis=-1, keepdims=True)
    return (m + jnp.log(jnp.sum(jnp.exp(t - m), axis=-1, keepdims=True)))[:, 0]


def _onehot_rows(idx_ref, table_ref):
    """Embedding lookup for one row tile: one-hot(idx) @ table on the MXU."""
    tm = idx_ref.shape[0]
    vpad = table_ref.shape[1]
    col = lax.broadcasted_iota(jnp.int32, (tm, vpad), 1)
    one_hot = (col == idx_ref[...]).astype(jnp.float32)          # (tm, vpad)
    rows = jnp.dot(one_hot, table_ref[...],
                   preferred_element_type=jnp.float32)           # (tm, vpad)
    return col, rows


def _logits_kernel(idx_ref, table_ref, logits_ref):
    _, rows = _onehot_rows(idx_ref, table_ref)
    logits_ref[...] = rows.astype(logits_ref.dtype)              # lane-dense


def _nll_tile_sum(col, rows, tgt_ref, vocab):
    # Column `vocab` of each gathered row carries the precomputed per-vocab-row
    # logsumexp (stashed by the wrapper); real targets are always < vocab, and
    # pad rows gathered an all-zero table row so both selects give 0.
    lse = jnp.sum(jnp.where(col == vocab, rows, 0.0), axis=-1, keepdims=True)
    picked = jnp.sum(jnp.where(col == tgt_ref[...], rows, 0.0),
                     axis=-1, keepdims=True)
    return jnp.sum(lse - picked, axis=0, keepdims=True)           # (1, 1)


def _logits_loss_kernel(idx_ref, tgt_ref, table_ref, logits_ref, nll_ref, *,
                        vocab):
    col, rows = _onehot_rows(idx_ref, table_ref)
    logits_ref[...] = rows.astype(logits_ref.dtype)               # lane-dense
    tile_sum = _nll_tile_sum(col, rows, tgt_ref, vocab)
    nll_ref[...] = jnp.broadcast_to(tile_sum, nll_ref.shape)      # (8, 128)


def _loss_kernel(idx_ref, tgt_ref, table_ref, nll_ref, *, vocab):
    # Loss-only fast path: skips the logits writeback (>99% of HBM traffic).
    col, rows = _onehot_rows(idx_ref, table_ref)
    tile_sum = _nll_tile_sum(col, rows, tgt_ref, vocab)
    nll_ref[...] = jnp.broadcast_to(tile_sum, nll_ref.shape)


def bigram_forward(table, idx, targets=None, *, tm=2048, return_logits=True,
                   logits_dtype=jnp.float32):
    """Mirrors BigramLanguageModel.forward(idx, targets).

    Returns (logits, loss):
      targets is None                       -> ((B, T, V) logits, None)
      targets given                         -> ((B*T, V) logits, scalar loss)
      targets given, return_logits=False    -> (None, scalar loss)
    """
    B, T = idx.shape
    V = table.shape[0]
    N = B * T
    vpad = _round_up(V + 1, _LANE)          # +1 spare column for the stashed lse
    tm, n_tiles, n_pad = _pick_tiling(N, tm)

    table_f32 = table.astype(jnp.float32)
    lse_rows = _logsumexp_rows(table_f32)   # (V,), computed once per call
    table_p = (jnp.zeros((vpad, vpad), jnp.float32)
               .at[:V, :V].set(table_f32)
               .at[:V, V].set(lse_rows))

    # Pad rows of idx select the all-zero table row V -> zero logits / zero NLL.
    idx_flat = jnp.full((n_pad, 1), V, jnp.int32).at[:N, 0].set(
        idx.reshape(-1).astype(jnp.int32))

    tok_spec = pl.BlockSpec((tm, 1), lambda i: (i, 0))
    tab_spec = pl.BlockSpec((vpad, vpad), lambda i: (0, 0))    # VMEM resident
    logits_spec = pl.BlockSpec((tm, vpad), lambda i: (i, 0))   # lane-dense
    nll_spec = pl.BlockSpec((8, _LANE), lambda i: (i, 0))      # (8,128) blocks

    compiler_params = pltpu.CompilerParams(
        dimension_semantics=("parallel",),   # shards tiles across TCs on v7x
        vmem_limit_bytes=32 * 1024 * 1024)

    matmul_flops = 2 * n_pad * vpad * vpad
    logits_bytes = n_pad * vpad * jnp.dtype(logits_dtype).itemsize
    table_bytes = vpad * vpad * 4
    nll_bytes = n_tiles * 8 * _LANE * 4

    if targets is None:
        logits_p = pl.pallas_call(
            _logits_kernel,
            out_shape=jax.ShapeDtypeStruct((n_pad, vpad), logits_dtype),
            grid=(n_tiles,),
            in_specs=[tok_spec, tab_spec],
            out_specs=logits_spec,
            compiler_params=compiler_params,
            cost_estimate=pl.CostEstimate(
                flops=matmul_flops, transcendentals=0,
                bytes_accessed=n_pad * 4 + table_bytes + logits_bytes),
        )(idx_flat, table_p)
        # PyTorch returns (B, T, C) logits when targets is None.
        return logits_p[:N, :V].reshape(B, T, V), None

    tgt_flat = jnp.zeros((n_pad, 1), jnp.int32).at[:N, 0].set(
        targets.reshape(-1).astype(jnp.int32))

    if return_logits:
        kernel = functools.partial(_logits_loss_kernel, vocab=V)
        logits_p, nll = pl.pallas_call(
            kernel,
            out_shape=(jax.ShapeDtypeStruct((n_pad, vpad), logits_dtype),
                       jax.ShapeDtypeStruct((n_tiles * 8, _LANE), jnp.float32)),
            grid=(n_tiles,),
            in_specs=[tok_spec, tok_spec, tab_spec],
            out_specs=(logits_spec, nll_spec),
            compiler_params=compiler_params,
            cost_estimate=pl.CostEstimate(
                flops=matmul_flops + 5 * n_pad * vpad, transcendentals=0,
                bytes_accessed=(2 * n_pad * 4 + table_bytes + logits_bytes
                                + nll_bytes)),
        )(idx_flat, tgt_flat, table_p)
        loss = jnp.sum(nll[::8, 0]) / N
        # PyTorch returns the (B*T, C) view of logits when targets are given.
        # TODO(synk): the [:N, :V] de-pad is one extra copy of the logits;
        # callers that can consume the padded (n_pad, vpad) layout should skip it.
        return logits_p[:N, :V], loss

    kernel = functools.partial(_loss_kernel, vocab=V)
    nll = pl.pallas_call(
        kernel,
        out_shape=jax.ShapeDtypeStruct((n_tiles * 8, _LANE), jnp.float32),
        grid=(n_tiles,),
        in_specs=[tok_spec, tok_spec, tab_spec],
        out_specs=nll_spec,
        compiler_params=compiler_params,
        cost_estimate=pl.CostEstimate(
            flops=matmul_flops + 5 * n_pad * vpad, transcendentals=0,
            bytes_accessed=2 * n_pad * 4 + table_bytes + nll_bytes),
    )(idx_flat, tgt_flat, table_p)
    loss = jnp.sum(nll[::8, 0]) / N
    return None, loss


if __name__ == "__main__":
    key = jax.random.PRNGKey(0)
    k_tab, k_idx, k_tgt = jax.random.split(key, 3)

    vocab_size = 65   # e.g. tiny-shakespeare char vocab
    B, T = 2, 8

    # nn.Embedding default init: N(0, 1)
    table = jax.random.normal(k_tab, (vocab_size, vocab_size), dtype=jnp.float32)
    idx = jax.random.randint(k_idx, (B, T), 0, vocab_size, dtype=jnp.int32)
    targets = jax.random.randint(k_tgt, (B, T), 0, vocab_size, dtype=jnp.int32)

    # Forward with targets (logits + loss).
    logits, loss = bigram_forward(table, idx, targets)
    jax.block_until_ready((logits, loss))

    # Forward without targets (logits only, shaped (B, T, C)).
    logits_nt, loss_nt = bigram_forward(table, idx, None)
    jax.block_until_ready(logits_nt)

    # Loss-only fast path (no logits writeback).
    _, loss_only = bigram_forward(table, idx, targets, return_logits=False)
    jax.block_until_ready(loss_only)

    # Pure-JAX reference.
    ref_logits = table[idx.reshape(-1)]
    ref_m = jnp.max(ref_logits, axis=-1)
    ref_lse = ref_m + jnp.log(jnp.sum(jnp.exp(ref_logits - ref_m[:, None]), axis=-1))
    ref_pick = ref_logits[jnp.arange(B * T), targets.reshape(-1)]
    ref_loss = jnp.mean(ref_lse - ref_pick)

    assert logits.shape == (B * T, vocab_size)
    assert logits_nt.shape == (B, T, vocab_size)
    assert loss_nt is None
    assert jnp.allclose(logits, ref_logits, atol=1e-5)
    assert jnp.allclose(logits_nt.reshape(B * T, vocab_size), ref_logits, atol=1e-5)
    assert jnp.allclose(loss, ref_loss, atol=1e-5)
    assert jnp.allclose(loss_only, ref_loss, atol=1e-5)

    # Multi-tile path (even tile count exercises the v7x 2-TC parallel axis).
    B2, T2 = 4, 64
    idx2 = jax.random.randint(k_idx, (B2, T2), 0, vocab_size, dtype=jnp.int32)
    tgt2 = jax.random.randint(k_tgt, (B2, T2), 0, vocab_size, dtype=jnp.int32)
    logits2, loss2 = bigram_forward(table, idx2, tgt2, tm=128)
    jax.block_until_ready((logits2, loss2))
    ref_logits2 = table[idx2.reshape(-1)]
    m2 = jnp.max(ref_logits2, axis=-1)
    lse2 = m2 + jnp.log(jnp.sum(jnp.exp(ref_logits2 - m2[:, None]), axis=-1))
    pick2 = ref_logits2[jnp.arange(B2 * T2), tgt2.reshape(-1)]
    ref_loss2 = jnp.mean(lse2 - pick2)
    assert jnp.allclose(logits2, ref_logits2, atol=1e-5)
    assert jnp.allclose(loss2, ref_loss2, atol=1e-5)

    print("KERNEL_OK")
</pallas_src>

<mosaic_0001>
module attributes {stable_mosaic.version = 11 : i64} {
  func.func @_logits_loss_kernel(%arg0: i32, %arg1: memref<16x1xi32, #tpu.memory_space<vmem>>, %arg2: memref<16x1xi32, #tpu.memory_space<vmem>>, %arg3: memref<128x128xf32, #tpu.memory_space<vmem>>, %arg4: memref<16x128xf32, #tpu.memory_space<vmem>>, %arg5: memref<8x128xf32, #tpu.memory_space<vmem>>) attributes {dimension_semantics = [#tpu.dimension_semantics<parallel>], iteration_bounds = array<i64: 1>, scalar_prefetch = 0 : i64, scratch_operands = 0 : i64, tpu.core_type = #tpu.core_type<tc>, window_params = [{transform_indices = @transform_0, window_bounds = array<i64: 16, 1>}, {transform_indices = @transform_1, window_bounds = array<i64: 16, 1>}, {pipeline_mode = #tpu.pipeline_mode<synchronous>, transform_indices = @transform_2, window_bounds = array<i64: 128, 128>}, {transform_indices = @transform_3, window_bounds = array<i64: 16, 128>}, {transform_indices = @transform_4, window_bounds = array<i64: 8, 128>}]} {
    %0 = tpu.iota {dimensions = array<i32: 1>} : vector<16x128xi32>
    %c0 = arith.constant 0 : index
    %c0_0 = arith.constant 0 : index
    %1 = vector.load %arg1[%c0, %c0_0] : memref<16x1xi32, #tpu.memory_space<vmem>>, vector<16x1xi32>
    %2 = vector.broadcast %1 : vector<16x1xi32> to vector<16x128xi32>
    %3 = arith.cmpi eq, %0, %2 : vector<16x128xi32>
    %4 = arith.extui %3 : vector<16x128xi1> to vector<16x128xi32>
    %5 = arith.sitofp %4 : vector<16x128xi32> to vector<16x128xf32>
    %c0_1 = arith.constant 0 : index
    %c0_2 = arith.constant 0 : index
    %6 = vector.load %arg3[%c0_1, %c0_2] : memref<128x128xf32, #tpu.memory_space<vmem>>, vector<128x128xf32>
    %cst = arith.constant dense<0.000000e+00> : vector<16x128xf32>
    %7 = tpu.matmul %5, %6, %cst {dimension_numbers = #tpu.dot_dimension_numbers<[1], [0], [0], [1], [0, 0, 1, 1], [], []>} : vector<16x128xf32>, vector<128x128xf32>, vector<16x128xf32> -> vector<16x128xf32>
    %c0_3 = arith.constant 0 : index
    %c0_4 = arith.constant 0 : index
    %8 = vector.load %arg4[%c0_3, %c0_4] : memref<16x128xf32, #tpu.memory_space<vmem>>, vector<16x128xf32>
    tpu.vector_store %arg4[%c0_3, %c0_4], %7 {strides = array<i32>} : memref<16x128xf32, #tpu.memory_space<vmem>>, vector<16x128xf32>,
    %c65_i32 = arith.constant 65 : i32
    %9 = vector.broadcast %c65_i32 : i32 to vector<16x128xi32>
    %10 = arith.cmpi eq, %0, %9 : vector<16x128xi32>
    %cst_5 = arith.constant 0.000000e+00 : f32
    %11 = vector.broadcast %cst_5 : f32 to vector<16x128xf32>
    %12 = arith.select %10, %7, %11 : vector<16x128xi1>, vector<16x128xf32>
    %cst_6 = arith.constant dense<0.000000e+00> : vector<16xf32>
    %13 = vector.multi_reduction <add>, %12, %cst_6 [1] : vector<16x128xf32> to vector<16xf32>
    %14 = vector.shape_cast %13 : vector<16xf32> to vector<16x1xf32>
    %c0_7 = arith.constant 0 : index
    %c0_8 = arith.constant 0 : index
    %15 = vector.load %arg2[%c0_7, %c0_8] : memref<16x1xi32, #tpu.memory_space<vmem>>, vector<16x1xi32>
    %16 = vector.broadcast %15 : vector<16x1xi32> to vector<16x128xi32>
    %17 = arith.cmpi eq, %0, %16 : vector<16x128xi32>
    %cst_9 = arith.constant 0.000000e+00 : f32
    %18 = vector.broadcast %cst_9 : f32 to vector<16x128xf32>
    %19 = arith.select %17, %7, %18 : vector<16x128xi1>, vector<16x128xf32>
    %cst_10 = arith.constant dense<0.000000e+00> : vector<16xf32>
    %20 = vector.multi_reduction <add>, %19, %cst_10 [1] : vector<16x128xf32> to vector<16xf32>
    %21 = vector.shape_cast %20 : vector<16xf32> to vector<16x1xf32>
    %22 = arith.subf %14, %21 : vector<16x1xf32>
    %cst_11 = arith.constant dense<0.000000e+00> : vector<1xf32>
    %23 = vector.multi_reduction <add>, %22, %cst_11 [0] : vector<16x1xf32> to vector<1xf32>
    %24 = vector.shape_cast %23 : vector<1xf32> to vector<1x1xf32>
    %25 = vector.shape_cast %24 : vector<1x1xf32> to vector<1x1xf32>
    %26 = vector.broadcast %25 : vector<1x1xf32> to vector<8x128xf32>
    %c0_12 = arith.constant 0 : index
    %c0_13 = arith.constant 0 : index
    %27 = vector.load %arg5[%c0_12, %c0_13] : memref<8x128xf32, #tpu.memory_space<vmem>>, vector<8x128xf32>
    tpu.vector_store %arg5[%c0_12, %c0_13], %26 {strides = array<i32>} : memref<8x128xf32, #tpu.memory_space<vmem>>, vector<8x128xf32>,
    return
  }
  func.func @transform_0(%arg0: i32) -> (i32, i32) {
    %c0_i32 = arith.constant 0 : i32
    %c0_i32_0 = arith.constant 0 : i32
    return %arg0, %c0_i32 : i32, i32
  }
  func.func @transform_1(%arg0: i32) -> (i32, i32) {
    %c0_i32 = arith.constant 0 : i32
    %c0_i32_0 = arith.constant 0 : i32
    return %arg0, %c0_i32 : i32, i32
  }
  func.func @transform_2(%arg0: i32) -> (i32, i32) {
    %c0_i32 = arith.constant 0 : i32
    %c0_i32_0 = arith.constant 0 : i32
    %c0_i32_1 = arith.constant 0 : i32
    return %c0_i32, %c0_i32_0 : i32, i32
  }
  func.func @transform_3(%arg0: i32) -> (i32, i32) {
    %c0_i32 = arith.constant 0 : i32
    %c0_i32_0 = arith.constant 0 : i32
    return %arg0, %c0_i32 : i32, i32
  }
  func.func @transform_4(%arg0: i32) -> (i32, i32) {
    %c0_i32 = arith.constant 0 : i32
    %c0_i32_0 = arith.constant 0 : i32
    return %arg0, %c0_i32 : i32, i32
  }
}

</mosaic_0001>

<bundles_post_ra>
// kernel: tpu_custom_call.1
= control target key start
LH: loop header
LB: loop body
LE: loop exit
PB: predicated region body
PF: predicated region fallthrough
CT: control target
= control target key end

     0   :  { %10 = vsyncpa [#allocation3], 0  ;;  %s461_s0 = inlined_call_operand.vmem [shape: s32[16,1], index: 0, kind: input, shape index: {}]   ;;  %s462_s1 = inlined_call_operand.vmem [shape: s32[16,1], index: 1, kind: input, shape index: {}]   ;;  %s463_s2 = inlined_call_operand.hbm [shape: f32[128,128], index: 2, kind: input, shape index: {}]   ;;  %s464_s3 = inlined_call_operand.hbm [shape: f32[16,128], index: 3, kind: output, shape index: {0}]   ;;  %s465_s4 = inlined_call_operand.hbm [shape: f32[8,128], index: 4, kind: output, shape index: {1}]  }
   0x1   :  { %11 = vsyncpa [#allocation4], 0 }
   0x2   :  { %12 = vsyncpa [#allocation7], 0  ;;  %s375_s15 = smov [#allocation2]   ;;  %s303_s19 = scalar_lea.hbm %s463_s2, 2048 }
   0x3   :  { %s22_s16 = sshll.u32 %s375_s15, 4  ;;  %p304_p0 = scmp.ne.s32.totalorder %s463_s2, %s303_s19  ;;  %s23_s16 = int_to_ptr.vmem [resolvable:$true] %s22_s16 }
   0x4   :  { %p307_p1 = scmp.lt.u32.totalorder %s303_s19, %s463_s2 }
   0x6   :  { %p309_p2 = pnand %p307_p1, %p304_p0 }
   0x8   :  { %312 = shalt.err (!%p309_p2)
}
   0x9   :  { %s313_s24 = scalar_lea.vmem %s23_s16, 2048  ;;  %p318_p4 = scmp.lt.s32.totalorder %s23_s16, %s23_s16 }
   0xa   :  { %p314_p3 = scmp.ne.s32.totalorder %s23_s16, %s313_s24  ;;  %p319_p5 = scmp.lt.s32.totalorder %s313_s24, %s313_s24 }
   0xc   :  { %p320_p6 = por %p319_p5, %p318_p4 }
   0xe   :  { %p321_p7 = pnand %p320_p6, %p314_p3 }
  0x10   :  { %324 = shalt.err (!%p321_p7)
}
  0x11   :  { %s376_s25 = smov 128   ;;  %s377_s26 = smov 8  }
  0x12   :  { %28 = dma.hbm_to_vmem [thread:$0]  %s463_s2, 2048, %s23_s16, [#allocation3], %s376_s25, %s376_s25, %s377_s26  }
  0x13   :  { %369 = dma.done.wait [#allocation3], 2048  }
  0x14   :  { %370 = vsyncadd [#allocation3], 4294965248  ;;  %v378_v0 = vmov 0   ;;  %v34_v1 = vld [vmem:[%s461_s0] sm:$0xff]  ;;  %v49_v3 = vld [vmem:[#allocation2 + $0x8] sm:$0xff]  ;;  %v32_v29 = vlaneseq  ;;  %v379_v32 = vmov 1.0  }
  0x15   :  { %301 = vset.pattern.permute.xlu0 %v378_v0  ;;  %302 = vset.pattern.permute.xlu1 %v378_v0  ;;  %v48_v2 = vld [vmem:[#allocation2] sm:$0xff]  ;;  %v50_v4 = vld [vmem:[#allocation2 + $0x10] sm:$0xff]  ;;  %v51_v5 = vld [vmem:[#allocation2 + $0x18] sm:$0xff] }
  0x16   :  { %37 = vperm.xlu0 %301, %v34_v1   ;;  %v35_v6 = vld [vmem:[%s461_s0 + $0x8] sm:$0xff]  ;;  %v262_v7 = vpack.c.bf16 %v49_v3, %v48_v2  ;;  %v266_v8 = vpack.c.bf16 %v51_v5, %v50_v4  ;;  %v52_v9 = vld [vmem:[#allocation2 + $0x20] sm:$0xff]  ;;  %v54_v13 = vld [vmem:[#allocation2 + $0x30] sm:$0xff]  ;;  %v33_v30 = vand.u32 127, %v32_v29  ;;  %s380_s0 = smov [#allocation5]  }
  0x17   :  { %v53_v10 = vld [vmem:[#allocation2 + $0x28] sm:$0xff]  ;;  %v148_v12 = vld [vmem:[%s462_s1] sm:$0xff]  ;;  %v55_v14 = vld [vmem:[#allocation2 + $0x38] sm:$0xff] }
  0x18   :  { %263 = vmatprep.subr.bf16.mxu0 %v262_v7  ;;  %v270_v11 = vpack.c.bf16 %v53_v10, %v52_v9  ;;  %151 = vperm.xlu1 %302, %v148_v12   ;;  %v149_v15 = vld [vmem:[%s462_s1 + $0x8] sm:$0xff]  ;;  %v274_v16 = vpack.c.bf16 %v55_v14, %v54_v13  ;;  %v56_v17 = vld [vmem:[#allocation2 + $0x40] sm:$0xff]  ;;  %v58_v20 = vld [vmem:[#allocation2 + $0x50] sm:$0xff]  ;;  %vm141_vm2 = vcmp.eq.s32.totalorder %v33_v30, 65  ;;  %s179_s1 = sshll.u32 %s380_s0, 4  ;;  %s180_s1 = int_to_ptr.vmem [resolvable:$true] %s179_s1 }
  0x19   :  { %265 = vmatpush3.bf16.msra.mxu0 %v262_v7  ;;  %v57_v18 = vld [vmem:[#allocation2 + $0x48] sm:$0xff]  ;;  %v59_v21 = vld [vmem:[#allocation2 + $0x58] sm:$0xff]  ;;  %v60_v23 = vld [vmem:[#allocation2 + $0x60] sm:$0xff]  ;;  %s325_s10 = scalar_lea.vmem %s180_s1, 256  ;;  %p330_p9 = scmp.lt.s32.totalorder %s180_s1, %s180_s1 }
  0x1a   :  { %40 = vperm.xlu0 %301, %v35_v6   ;;  %267 = vmatprep.subr.bf16.mxu0 %v266_v8  ;;  %v278_v19 = vpack.c.bf16 %v57_v18, %v56_v17  ;;  %v282_v22 = vpack.c.bf16 %v59_v21, %v58_v20  ;;  %v61_v24 = vld [vmem:[#allocation2 + $0x68] sm:$0xff]  ;;  %v62_v26 = vld [vmem:[#allocation2 + $0x70] sm:$0xff]  ;;  %v63_v27 = vld [vmem:[#allocation2 + $0x78] sm:$0xff]  ;;  %p326_p8 = scmp.ne.s32.totalorder %s180_s1, %s325_s10  ;;  %p331_p10 = scmp.lt.s32.totalorder %s325_s10, %s325_s10 }
  0x1b   :  { %v286_v25 = vpack.c.bf16 %v61_v24, %v60_v23  ;;  %v290_v28 = vpack.c.bf16 %v63_v27, %v62_v26 }
  0x1c   :  { %154 = vperm.xlu1 %302, %v149_v15   ;;  %p332_p11 = por %p331_p10, %p330_p9 }
  0x1d   :  { %269 = vmatpush3.bf16.msra.mxu0 %v266_v8 }
  0x1e   :  { %271 = vmatprep.subr.bf16.mxu0 %v270_v11  ;;  %p333_p12 = pnand %p332_p11, %p326_p8 }
  0x21   :  { %273 = vmatpush3.bf16.msra.mxu0 %v270_v11 }
  0x22   :  { %275 = vmatprep.subr.bf16.mxu0 %v274_v16 }
  0x25   :  { %277 = vmatpush3.bf16.msra.mxu0 %v274_v16 }
  0x26   :  { %279 = vmatprep.subr.bf16.mxu0 %v278_v19 }
  0x29   :  { %281 = vmatpush3.bf16.msra.mxu0 %v278_v19 }
  0x2a   :  { %283 = vmatprep.subr.bf16.mxu0 %v282_v22 }
  0x2d   :  { %285 = vmatpush3.bf16.msra.mxu0 %v282_v22 }
  0x2e   :  { %287 = vmatprep.subr.bf16.mxu0 %v286_v25 }
  0x31   :  { %289 = vmatpush3.bf16.msra.mxu0 %v286_v25 }
  0x32   :  { %291 = vmatprep.subr.bf16.mxu0 %v290_v28 }
  0x35   :  { %293 = vmatpush3.bf16.msra.mxu0 %v290_v28 }
  0x95   :  { %v38_v31 = vpop.permute.xlu0 %37 }
  0x96   :  { %vm42_vm0 = vcmp.eq.s32.totalorder %v33_v30, %v38_v31 }
  0x97   :  { %259 = vmatprep.mubr.msk.f32.mxu0 %vm42_vm0, %v379_v32  ;;  %v152_v34 = vpop.permute.xlu1 %151 }
  0x98   :  { %vm156_vm3 = vcmp.eq.s32.totalorder %v33_v30, %v152_v34 }
  0x99   :  { %v41_v33 = vpop.permute.xlu0 %40 }
  0x9a   :  { %vm43_vm1 = vcmp.eq.s32.totalorder %v33_v30, %v41_v33 }
  0x9b   :  { %260 = vmatmul.mubr.msk.f32.vlgmr.msra.gmra.mrb[0].mxu0 %vm43_vm1, %v379_v32  ;;  %v155_v39 = vpop.permute.xlu1 %154 }
  0x9c   :  { %vm157_vm4 = vcmp.eq.s32.totalorder %v33_v30, %v155_v39 }
 0x16e   :  { %v261_v35 = vpop.f32.mrb[0].mxu0 }
 0x16f   :  { %140 = vst [vmem:[#allocation5 + $0x8] sm:$0xff] %v261_v35  ;;  %v130_v36 = vpop.f32.mrb[1].mxu0  ;;  %v143_v37 = vsel %vm141_vm2, %v261_v35, 0.0  ;;  %v159_v41 = vsel %vm157_vm4, %v261_v35, 0.0 }
 0x170   :  { %139 = vst [vmem:[#allocation5] sm:$0xff] %v130_v36  ;;  %146 = vadd.xlane.f32.xlu1 %v143_v37  ;;  %v142_v38 = vsel %vm141_vm2, %v130_v36, 0.0  ;;  %v158_v40 = vsel %vm156_vm3, %v130_v36, 0.0 }
 0x171   :  { %144 = vadd.xlane.f32.xlu0 %v142_v38 }
 0x175   :  { %160 = vadd.xlane.f32.xlu0 %v158_v40 }
 0x179   :  { %162 = vadd.xlane.f32.xlu0 %v159_v41 }
 0x17a   :  { %336 = shalt.err (!%p333_p12)
}
 0x17b   :  { %s337_s13 = scalar_lea.hbm %s464_s3, 256 }
 0x17c   :  { %p338_p13 = scmp.ne.s32.totalorder %s464_s3, %s337_s13  ;;  %p341_p0 = scmp.lt.u32.totalorder %s337_s13, %s464_s3 }
 0x17e   :  { %p343_p1 = pnand %p341_p0, %p338_p13 }
 0x180   :  { %346 = shalt.err (!%p343_p1)
}
 0x181   :  { %185 = dma.vmem_to_hbm [thread:$0]  %s180_s1, 256, %s464_s3, [#allocation4], %s376_s25, %s376_s25, %s377_s26  }
 0x182   :  { %s381_s20 = smov [#allocation6]  }
 0x183   :  { %s192_s21 = sshll.u32 %s381_s20, 4  ;;  %s193_s21 = int_to_ptr.vmem [resolvable:$true] %s192_s21 }
 0x184   :  { %s347_s22 = scalar_lea.vmem %s193_s21, 128  ;;  %p352_p3 = scmp.lt.s32.totalorder %s193_s21, %s193_s21 }
 0x185   :  { %p348_p2 = scmp.ne.s32.totalorder %s193_s21, %s347_s22  ;;  %p353_p4 = scmp.lt.s32.totalorder %s347_s22, %s347_s22 }
 0x187   :  { %p354_p5 = por %p353_p4, %p352_p3 }
 0x189   :  { %p355_p6 = pnand %p354_p5, %p348_p2 }
 0x1fd   :  { %v147_v44 = vpop.xlane.xlu1 %146 }
 0x1fe   :  { %v145_v42 = vpop.xlane.xlu0 %144 }
 0x202   :  { %v161_v43 = vpop.xlane.xlu0 %160 }
 0x203   :  { %v164_v46 = vsub.f32 %v145_v42, %v161_v43 }
 0x206   :  { %v163_v45 = vpop.xlane.xlu0 %162 }
 0x207   :  { %v165_v47 = vsub.f32 %v147_v44, %v163_v45 }
 0x209   :  { %v166_v48 = vadd.f32 %v165_v47, %v164_v46 }
 0x20b   :  { %v167_v49 = vrot.slane %v166_v48, 4 }
 0x20d   :  { %v168_v50 = vadd.f32 %v167_v49, %v166_v48 }
 0x20f   :  { %v169_v51 = vrot.slane %v168_v50, 2 }
 0x211   :  { %v170_v52 = vadd.f32 %v169_v51, %v168_v50 }
 0x213   :  { %v171_v53 = vrot.slane %v170_v52, 1 }
 0x215   :  { %v172_v54 = vadd.f32 %v171_v53, %v170_v52 }
 0x217   :  { %173 = vst [vmem:[#allocation6] sm:$0xff] %v172_v54 }
 0x218   :  { %358 = shalt.err (!%p355_p6)
}
 0x219   :  { %s359_s24 = scalar_lea.hbm %s465_s4, 128 }
 0x21a   :  { %p360_p7 = scmp.ne.s32.totalorder %s465_s4, %s359_s24  ;;  %p363_p8 = scmp.lt.u32.totalorder %s359_s24, %s465_s4 }
 0x21c   :  { %p365_p9 = pnand %p363_p8, %p360_p7 }
 0x21e   :  { %368 = shalt.err (!%p365_p9)
}
 0x21f   :  { %195 = dma.vmem_to_hbm [thread:$0]  %s193_s21, 128, %s465_s4, [#allocation7]  }
 0x220   :  { %371 = dma.done.wait [#allocation4], 256  }
 0x221   :  { %372 = vsyncadd [#allocation4], 4294967040 }
 0x222   :  { %373 = dma.done.wait [#allocation7], 128  }
 0x223   :  { %374 = vsyncadd [#allocation7], 4294967168 }
 0x224   :  { %202 = vsyncpa [#allocation3], 1 }
 0x225   :  { %203 = vsyncpa [#allocation4], 1 }
 0x226   :  { %204 = vsyncpa [#allocation7], 1 }

</bundles_post_ra>
